<compile_context>
chip_gen: v7x
topology: tpu7x:2x2x1
jax: 0.10.0
libtpu: 0.0.40
codegen_flags: <defaults>
</compile_context>

<pallas_src>
import functools

import jax
import jax.numpy as jnp
from jax.experimental import pallas as pl
from jax.experimental.pallas import tpu as pltpu

BN_EPS = 1e-5


def _round_up(x, m):
    return ((x + m - 1) // m) * m


def _pad2d(a, rows, cols):
    r, c = a.shape
    if r == rows and c == cols:
        return a          # avoid materializing an extra HBM copy when aligned
    return jnp.pad(a, ((0, rows - r), (0, cols - c)))


def _linear_layer_kernel(*refs, add_skip):
    if add_skip:
        x_ref, w_ref, b_ref, xs_ref, o_ref, acc_ref = refs
    else:
        x_ref, w_ref, b_ref, o_ref, acc_ref = refs
        xs_ref = None

    k = pl.program_id(2)

    # ---- init accumulator on first K step ---------------------------------
    @pl.when(k == 0)
    def _init():
        acc_ref[...] = jnp.zeros_like(acc_ref)

    # ---- canonical (M,K)@(K,N) MXU matmul; operands already compute-dtype --
    acc_ref[...] += jnp.dot(x_ref[...], w_ref[...],
                            preferred_element_type=jnp.float32)

    # ---- finalize on last K step: bias + ReLU (+ skip), write out ----------
    @pl.when(k == pl.num_programs(2) - 1)
    def _finalize():
        z = jnp.maximum(acc_ref[...] + b_ref[...], 0.0)   # bias row broadcasts
        if add_skip:
            # Dropout (eval) is identity; skip adds raw f32 x at the N-slice.
            z = z + xs_ref[...].astype(jnp.float32)
        o_ref[...] = z.astype(o_ref.dtype)


def linear_layer_forward(x, gamma, beta, running_mean, running_var, weight,
                         *, block_m=256, block_n=256, block_k=512,
                         compute_dtype=jnp.bfloat16):
    """Fused forward of the PyTorch LinearLayer module (eval mode).

    x:      (B, F_in) float32
    gamma, beta, running_mean, running_var: (F_in,) float32  (BatchNorm1d params)
    weight: (F_out, F_in) float32  (PyTorch nn.Linear weight layout, no bias)
    """
    B, f_in = x.shape
    f_out, f_in_w = weight.shape
    assert f_in_w == f_in
    add_skip = (f_in == f_out)

    # ---- Parameter prep (would normally happen once at module setup) ------
    scale = gamma * jax.lax.rsqrt(running_var + BN_EPS)        # (F_in,)
    shift = beta - running_mean * scale                        # (F_in,)
    w_t = (weight * scale[None, :]).T                          # (F_in, F_out) = (K, N)
    bias = weight @ shift                                      # (F_out,)

    itemsize = jnp.dtype(compute_dtype).itemsize
    sub = 16 if itemsize == 2 else 8       # bf16 packs two rows per sublane

    # ---- Tile sizes (lane/sublane aligned), clamped to the padded problem --
    bm = min(block_m, _round_up(B, sub))
    bk = min(block_k, _round_up(f_in, 128))
    bn = min(block_n, _round_up(f_out, 128))
    m_pad = _round_up(B, bm)
    k_pad = _round_up(f_in, bk)
    n_pad = _round_up(f_out, bn)

    # v7x has 2 TensorCores: keep >=2 output tiles on the parallel axes when
    # the problem allows, so both cores get work (no-op on v5e/v6e).
    if (m_pad // bm) * (n_pad // bn) < 2:
        if bn >= 256:
            bn //= 2
        elif bm >= 2 * sub:
            bm = _round_up(bm // 2, sub)
        m_pad = _round_up(B, bm)
        n_pad = _round_up(f_out, bn)

    grid = (m_pad // bm, n_pad // bn, k_pad // bk)

    # ---- Operands: matmul x in compute dtype; skip x stays f32 ------------
    x_mm = _pad2d(x, m_pad, k_pad).astype(compute_dtype)
    w_p = _pad2d(w_t, k_pad, n_pad).astype(compute_dtype)
    b_p = jnp.pad(bias, (0, n_pad - f_out)).reshape(1, n_pad).astype(jnp.float32)

    in_specs = [
        pl.BlockSpec((bm, bk), lambda i, j, k: (i, k)),    # x        (M, K)
        pl.BlockSpec((bk, bn), lambda i, j, k: (k, j)),    # W_folded (K, N)
        pl.BlockSpec((1, bn), lambda i, j, k: (0, j)),     # folded-BN bias row
    ]
    operands = [x_mm, w_p, b_p]
    if add_skip:
        x_skip = _pad2d(x, m_pad, n_pad)                   # f32 skip operand
        in_specs.append(pl.BlockSpec((bm, bn), lambda i, j, k: (i, j)))
        operands.append(x_skip)

    out_itemsize = jnp.dtype(x.dtype).itemsize
    bytes_accessed = (x_mm.size * itemsize + w_p.size * itemsize
                      + b_p.size * 4 + m_pad * n_pad * out_itemsize
                      + (x.size * out_itemsize if add_skip else 0))
    cost = pl.CostEstimate(flops=2 * m_pad * n_pad * k_pad,
                           transcendentals=0,
                           bytes_accessed=int(bytes_accessed))

    # VMEM budget: double-buffered input/output tiles + f32 accumulator.
    vmem_needed = (2 * (bm * bk + bk * bn) * itemsize
                   + 2 * bm * bn * out_itemsize
                   + (2 * bm * bn * out_itemsize if add_skip else 0)
                   + bm * bn * 4 + 2 * bn * 4)
    vmem_limit = int(min(max(2 * vmem_needed, 32 << 20), 48 << 20))

    kernel = functools.partial(_linear_layer_kernel, add_skip=add_skip)

    out = pl.pallas_call(
        kernel,
        out_shape=jax.ShapeDtypeStruct((m_pad, n_pad), x.dtype),
        grid_spec=pltpu.PrefetchScalarGridSpec(
            num_scalar_prefetch=0,
            grid=grid,
            in_specs=in_specs,
            out_specs=pl.BlockSpec((bm, bn), lambda i, j, k: (i, j)),
            scratch_shapes=[pltpu.VMEM((bm, bn), jnp.float32)],
        ),
        compiler_params=pltpu.CompilerParams(
            dimension_semantics=("parallel", "parallel", "arbitrary"),
            vmem_limit_bytes=vmem_limit,
        ),
        cost_estimate=cost,
    )(*operands)
    if m_pad == B and n_pad == f_out:
        return out
    return out[:B, :f_out]


def _reference(x, gamma, beta, mean, var, weight, add_skip):
    inv = jax.lax.rsqrt(var + BN_EPS)
    xn = (x - mean[None, :]) * inv[None, :] * gamma[None, :] + beta[None, :]
    z = jnp.maximum(xn @ weight.T, 0.0)
    return z + x if add_skip else z


if __name__ == "__main__":
    in_features = 32
    drop_rate = 0.1     # eval mode: dropout is identity
    batch = 8

    key = jax.random.PRNGKey(0)

    # Test both the skip (F_out == F_in) and non-skip (F_out != F_in) paths.
    for out_features in (32, 64):
        kx, kw, kg, kb, km, kv, key = jax.random.split(key, 7)

        x = jax.random.normal(kx, (batch, in_features), dtype=jnp.float32)
        weight = jax.random.normal(kw, (out_features, in_features), jnp.float32) * 0.1
        gamma = 1.0 + 0.1 * jax.random.normal(kg, (in_features,), jnp.float32)
        beta = 0.1 * jax.random.normal(kb, (in_features,), jnp.float32)
        running_mean = 0.1 * jax.random.normal(km, (in_features,), jnp.float32)
        running_var = 1.0 + 0.1 * jax.random.uniform(kv, (in_features,), jnp.float32)

        add_skip = (in_features == out_features)
        ref = _reference(x, gamma, beta, running_mean, running_var, weight, add_skip)

        # bf16 MXU path (default) -- relaxed tolerance.
        out_bf16 = linear_layer_forward(x, gamma, beta, running_mean, running_var,
                                        weight, compute_dtype=jnp.bfloat16)
        # f32 path -- tight tolerance, validates the tiling/fold logic exactly.
        out_f32 = linear_layer_forward(x, gamma, beta, running_mean, running_var,
                                       weight, compute_dtype=jnp.float32)
        out_bf16, out_f32 = jax.block_until_ready((out_bf16, out_f32))

        assert out_bf16.shape == (batch, out_features)
        assert out_f32.shape == (batch, out_features)
        assert jnp.allclose(out_f32, ref, atol=1e-4, rtol=1e-4), \
            f"f32 mismatch vs reference (out_features={out_features})"
        assert jnp.allclose(out_bf16, ref, atol=5e-2, rtol=5e-2), \
            f"bf16 mismatch vs reference (out_features={out_features})"

    print("KERNEL_OK")
</pallas_src>

<mosaic_0001>
module attributes {stable_mosaic.version = 11 : i64} {
  func.func @_linear_layer_kernel(%arg0: i32, %arg1: i32, %arg2: i32, %arg3: memref<16x128xbf16, #tpu.memory_space<vmem>>, %arg4: memref<128x128xbf16, #tpu.memory_space<vmem>>, %arg5: memref<1x128xf32, #tpu.memory_space<vmem>>, %arg6: memref<16x128xf32, #tpu.memory_space<vmem>>, %arg7: memref<16x128xf32, #tpu.memory_space<vmem>>, %arg8: memref<16x128xf32, #tpu.memory_space<vmem>>) attributes {dimension_semantics = [#tpu.dimension_semantics<parallel>, #tpu.dimension_semantics<parallel>, #tpu.dimension_semantics<arbitrary>], iteration_bounds = array<i64: 1, 1, 1>, scalar_prefetch = 0 : i64, scratch_operands = 1 : i64, tpu.core_type = #tpu.core_type<tc>, window_params = [{transform_indices = @transform_0, window_bounds = array<i64: 16, 128>}, {transform_indices = @transform_1, window_bounds = array<i64: 128, 128>}, {transform_indices = @transform_2, window_bounds = array<i64: 1, 128>}, {transform_indices = @transform_3, window_bounds = array<i64: 16, 128>}, {transform_indices = @transform_4, window_bounds = array<i64: 16, 128>}]} {
    %c0_i32 = arith.constant 0 : i32
    %0 = arith.cmpi eq, %arg2, %c0_i32 : i32
    %1 = arith.extui %0 : i1 to i32
    %c0_i32_0 = arith.constant 0 : i32
    %2 = arith.cmpi ne, %1, %c0_i32_0 : i32
    scf.if %2 {
      %cst_10 = arith.constant 0.000000e+00 : f32
      %12 = vector.broadcast %cst_10 : f32 to vector<16x128xf32>
      %c0_11 = arith.constant 0 : index
      %c0_12 = arith.constant 0 : index
      %13 = vector.load %arg8[%c0_11, %c0_12] : memref<16x128xf32, #tpu.memory_space<vmem>>, vector<16x128xf32>
      tpu.vector_store %arg8[%c0_11, %c0_12], %12 {strides = array<i32>} : memref<16x128xf32, #tpu.memory_space<vmem>>, vector<16x128xf32>,
    } else {
    }
    %c0 = arith.constant 0 : index
    %c0_1 = arith.constant 0 : index
    %3 = vector.load %arg8[%c0, %c0_1] : memref<16x128xf32, #tpu.memory_space<vmem>>, vector<16x128xf32>
    %c0_2 = arith.constant 0 : index
    %c0_3 = arith.constant 0 : index
    %4 = vector.load %arg3[%c0_2, %c0_3] : memref<16x128xbf16, #tpu.memory_space<vmem>>, vector<16x128xbf16>
    %c0_4 = arith.constant 0 : index
    %c0_5 = arith.constant 0 : index
    %5 = vector.load %arg4[%c0_4, %c0_5] : memref<128x128xbf16, #tpu.memory_space<vmem>>, vector<128x128xbf16>
    %cst = arith.constant dense<0.000000e+00> : vector<16x128xf32>
    %6 = tpu.matmul %4, %5, %cst {dimension_numbers = #tpu.dot_dimension_numbers<[1], [0], [0], [1], [0, 0, 1, 1], [], []>} : vector<16x128xbf16>, vector<128x128xbf16>, vector<16x128xf32> -> vector<16x128xf32>
    %7 = arith.addf %3, %6 : vector<16x128xf32>
    %c0_6 = arith.constant 0 : index
    %c0_7 = arith.constant 0 : index
    %8 = vector.load %arg8[%c0_6, %c0_7] : memref<16x128xf32, #tpu.memory_space<vmem>>, vector<16x128xf32>
    tpu.vector_store %arg8[%c0_6, %c0_7], %7 {strides = array<i32>} : memref<16x128xf32, #tpu.memory_space<vmem>>, vector<16x128xf32>,
    %c0_i32_8 = arith.constant 0 : i32
    %9 = arith.cmpi eq, %arg2, %c0_i32_8 : i32
    %10 = arith.extui %9 : i1 to i32
    %c0_i32_9 = arith.constant 0 : i32
    %11 = arith.cmpi ne, %10, %c0_i32_9 : i32
    scf.if %11 {
      %c0_10 = arith.constant 0 : index
      %c0_11 = arith.constant 0 : index
      %12 = vector.load %arg8[%c0_10, %c0_11] : memref<16x128xf32, #tpu.memory_space<vmem>>, vector<16x128xf32>
      %c0_12 = arith.constant 0 : index
      %c0_13 = arith.constant 0 : index
      %13 = vector.load %arg5[%c0_12, %c0_13] : memref<1x128xf32, #tpu.memory_space<vmem>>, vector<1x128xf32>
      %14 = vector.broadcast %13 : vector<1x128xf32> to vector<16x128xf32>
      %15 = arith.addf %12, %14 : vector<16x128xf32>
      %cst_14 = arith.constant 0.000000e+00 : f32
      %16 = vector.broadcast %cst_14 : f32 to vector<16x128xf32>
      %17 = arith.maximumf %15, %16 : vector<16x128xf32>
      %c0_15 = arith.constant 0 : index
      %c0_16 = arith.constant 0 : index
      %18 = vector.load %arg6[%c0_15, %c0_16] : memref<16x128xf32, #tpu.memory_space<vmem>>, vector<16x128xf32>
      %19 = arith.addf %17, %18 : vector<16x128xf32>
      %c0_17 = arith.constant 0 : index
      %c0_18 = arith.constant 0 : index
      %20 = vector.load %arg7[%c0_17, %c0_18] : memref<16x128xf32, #tpu.memory_space<vmem>>, vector<16x128xf32>
      tpu.vector_store %arg7[%c0_17, %c0_18], %19 {strides = array<i32>} : memref<16x128xf32, #tpu.memory_space<vmem>>, vector<16x128xf32>,
    } else {
    }
    return
  }
  func.func @transform_0(%arg0: i32, %arg1: i32, %arg2: i32) -> (i32, i32) {
    %c0_i32 = arith.constant 0 : i32
    return %arg0, %arg2 : i32, i32
  }
  func.func @transform_1(%arg0: i32, %arg1: i32, %arg2: i32) -> (i32, i32) {
    %c0_i32 = arith.constant 0 : i32
    return %arg2, %arg1 : i32, i32
  }
  func.func @transform_2(%arg0: i32, %arg1: i32, %arg2: i32) -> (i32, i32) {
    %c0_i32 = arith.constant 0 : i32
    %c0_i32_0 = arith.constant 0 : i32
    return %c0_i32, %arg1 : i32, i32
  }
  func.func @transform_3(%arg0: i32, %arg1: i32, %arg2: i32) -> (i32, i32) {
    %c0_i32 = arith.constant 0 : i32
    return %arg0, %arg1 : i32, i32
  }
  func.func @transform_4(%arg0: i32, %arg1: i32, %arg2: i32) -> (i32, i32) {
    %c0_i32 = arith.constant 0 : i32
    return %arg0, %arg1 : i32, i32
  }
}

</mosaic_0001>

<bundles_post_ra>
// kernel: tpu_custom_call.1
= control target key start
LH: loop header
LB: loop body
LE: loop exit
PB: predicated region body
PF: predicated region fallthrough
CT: control target
= control target key end

     0   :  { %9 = vsyncpa [#allocation4], 0  ;;  %s476_s0 = inlined_call_operand.hbm [shape: bf16[16,128], index: 0, kind: input, shape index: {}]   ;;  %s477_s1 = inlined_call_operand.hbm [shape: bf16[128,128], index: 1, kind: input, shape index: {}]   ;;  %s478_s2 = inlined_call_operand.vmem [shape: f32[1,128], index: 2, kind: input, shape index: {}]   ;;  %s479_s3 = inlined_call_operand.hbm [shape: f32[16,128], index: 3, kind: input, shape index: {}]   ;;  %s480_s4 = inlined_call_operand.hbm [shape: f32[16,128], index: 4, kind: output, shape index: {}]  }
   0x1   :  { %10 = vsyncpa [#allocation7], 0 }
   0x2   :  { %11 = vsyncpa [#allocation5], 0  ;;  %s377_s15 = smov [#allocation6]   ;;  %s378_s17 = smov [#allocation3]  }
   0x3   :  { %s29_s16 = sshll.u32 %s377_s15, 4  ;;  %s17_s18 = sshll.u32 %s378_s17, 4  ;;  %s30_s16 = int_to_ptr.vmem [resolvable:$true] %s29_s16  ;;  %s412_s18 = int_to_ptr.vmem [resolvable:$true] %s17_s18 }
   0x4   :  { %s283_s21 = scalar_lea.hbm %s477_s1, 1024 }
   0x5   :  { %p284_p0 = scmp.ne.s32.totalorder %s477_s1, %s283_s21  ;;  %p287_p1 = scmp.lt.u32.totalorder %s283_s21, %s477_s1 }
   0x7   :  { %p289_p2 = pnand %p287_p1, %p284_p0 }
   0x9   :  { %292 = shalt.err (!%p289_p2)
}
   0xa   :  { %s293_s26 = scalar_lea.vmem %s30_s16, 1024  ;;  %p298_p4 = scmp.lt.s32.totalorder %s30_s16, %s30_s16 }
   0xb   :  { %p294_p3 = scmp.ne.s32.totalorder %s30_s16, %s293_s26  ;;  %p299_p5 = scmp.lt.s32.totalorder %s293_s26, %s293_s26 }
   0xd   :  { %p300_p6 = por %p299_p5, %p298_p4 }
   0xf   :  { %p301_p7 = pnand %p300_p6, %p294_p3 }
  0x11   :  { %304 = shalt.err (!%p301_p7)
}
  0x12   :  { %s379_s27 = smov 64   ;;  %s380_s28 = smov 4  }
  0x13   :  { %35 = dma.hbm_to_vmem [thread:$0]  %s477_s1, 1024, %s30_s16, [#allocation7], %s379_s27, %s379_s27, %s380_s28  }
  0x14   :  { %s305_s7 = scalar_lea.hbm %s476_s0, 128 }
  0x15   :  { %p306_p8 = scmp.ne.s32.totalorder %s476_s0, %s305_s7  ;;  %p309_p9 = scmp.lt.u32.totalorder %s305_s7, %s476_s0 }
  0x17   :  { %p311_p10 = pnand %p309_p9, %p306_p8 }
  0x19   :  { %314 = shalt.err (!%p311_p10)
}
  0x1a   :  { %s315_s12 = scalar_lea.vmem %s412_s18, 128  ;;  %p320_p12 = scmp.lt.s32.totalorder %s412_s18, %s412_s18 }
  0x1b   :  { %p316_p11 = scmp.ne.s32.totalorder %s412_s18, %s315_s12  ;;  %p321_p13 = scmp.lt.s32.totalorder %s315_s12, %s315_s12 }
  0x1d   :  { %p322_p0 = por %p321_p13, %p320_p12 }
  0x1f   :  { %p323_p1 = pnand %p322_p0, %p316_p11 }
  0x21   :  { %326 = shalt.err (!%p323_p1)
}
  0x22   :  { %23 = dma.hbm_to_vmem [thread:$0]  %s476_s0, 128, %s412_s18, [#allocation4], %s379_s27, %s379_s27, %s380_s28  }
  0x23   :  { %s381_s14 = smov [#allocation8]   ;;  %s327_s19 = scalar_lea.hbm %s479_s3, 256 }
  0x24   :  { %s43_s15 = sshll.u32 %s381_s14, 4  ;;  %p328_p2 = scmp.ne.s32.totalorder %s479_s3, %s327_s19  ;;  %s44_s15 = int_to_ptr.vmem [resolvable:$true] %s43_s15 }
  0x25   :  { %p331_p3 = scmp.lt.u32.totalorder %s327_s19, %s479_s3 }
  0x27   :  { %p333_p4 = pnand %p331_p3, %p328_p2 }
  0x29   :  { %336 = shalt.err (!%p333_p4)
}
  0x2a   :  { %s337_s24 = scalar_lea.vmem %s44_s15, 256  ;;  %p342_p6 = scmp.lt.s32.totalorder %s44_s15, %s44_s15 }
  0x2b   :  { %p338_p5 = scmp.ne.s32.totalorder %s44_s15, %s337_s24  ;;  %p343_p7 = scmp.lt.s32.totalorder %s337_s24, %s337_s24 }
  0x2d   :  { %p344_p8 = por %p343_p7, %p342_p6 }
  0x2f   :  { %p345_p9 = pnand %p344_p8, %p338_p5 }
  0x31   :  { %348 = shalt.err (!%p345_p9)
}
  0x32   :  { %s382_s0 = smov 128   ;;  %s383_s18 = smov 8  }
  0x33   :  { %49 = dma.hbm_to_vmem [thread:$0]  %s479_s3, 256, %s44_s15, [#allocation7], %s382_s0, %s382_s0, %s383_s18  }
  0x34   :  { %371 = dma.done.wait [#allocation4], 128  }
  0x35   :  { %372 = vsyncadd [#allocation4], 4294967168 }
  0x36   :  { %373 = dma.done.wait [#allocation7], 1280  }
  0x37   :  { %374 = vsyncadd [#allocation7], 4294966016  ;;  %v384_v0 = vmov 0.0   ;;  %vm385_vm0 = vmmov 0   ;;  %v274_v1 = vld [vmem:[#allocation6] sm:$0xff]   ;;  %v275_v2 = vld [vmem:[#allocation6 + $0x8] sm:$0xff]  }
  0x38   :  { %244 = vmatprep.subr.bf16.mxu0 %v384_v0  ;;  %260 = vmatprep.mubr.msk.bf16.mxu0 %vm385_vm0, %v384_v0  ;;  %v276_v3 = vld [vmem:[#allocation6 + $0x10] sm:$0xff]   ;;  %v277_v4 = vld [vmem:[#allocation6 + $0x18] sm:$0xff]   ;;  %v278_v5 = vld [vmem:[#allocation6 + $0x20] sm:$0xff]   ;;  %s386_s28 = smov [#allocation9]  }
  0x39   :  { %245 = vmatpush3.bf16.msra.mxu0 %v274_v1  ;;  %v279_v6 = vld [vmem:[#allocation6 + $0x28] sm:$0xff]   ;;  %v280_v7 = vld [vmem:[#allocation6 + $0x30] sm:$0xff]   ;;  %v281_v8 = vld [vmem:[#allocation6 + $0x38] sm:$0xff]   ;;  %s212_s29 = sshll.u32 %s386_s28, 4  ;;  %s213_s29 = int_to_ptr.vmem [resolvable:$true] %s212_s29 }
  0x3a   :  { %246 = vmatprep.subr.bf16.mxu0 %v384_v0  ;;  %v282_v9 = vld [vmem:[#allocation3] sm:$0xff]   ;;  %v201_v14 = vld [vmem:[#allocation8] sm:$0xff]  ;;  %v202_v19 = vld [vmem:[#allocation8 + $0x8] sm:$0xff]  ;;  %s349_s30 = scalar_lea.vmem %s213_s29, 256  ;;  %p354_p11 = scmp.lt.s32.totalorder %s213_s29, %s213_s29 }
  0x3b   :  { %v234_v10 = vld [vmem:[%s478_s2] ss:$0 sm:$0xff]  ;;  %p350_p10 = scmp.ne.s32.totalorder %s213_s29, %s349_s30  ;;  %p355_p12 = scmp.lt.s32.totalorder %s349_s30, %s349_s30 }
  0x3d   :  { %247 = vmatpush3.bf16.msra.mxu0 %v275_v2  ;;  %p356_p13 = por %p355_p12, %p354_p11 }
  0x3e   :  { %248 = vmatprep.subr.bf16.mxu0 %v384_v0 }
  0x3f   :  { %p357_p0 = pnand %p356_p13, %p350_p10 }
  0x41   :  { %249 = vmatpush3.bf16.msra.mxu0 %v276_v3 }
  0x42   :  { %250 = vmatprep.subr.bf16.mxu0 %v384_v0 }
  0x45   :  { %251 = vmatpush3.bf16.msra.mxu0 %v277_v4 }
  0x46   :  { %252 = vmatprep.subr.bf16.mxu0 %v384_v0 }
  0x49   :  { %253 = vmatpush3.bf16.msra.mxu0 %v278_v5 }
  0x4a   :  { %254 = vmatprep.subr.bf16.mxu0 %v384_v0 }
  0x4d   :  { %255 = vmatpush3.bf16.msra.mxu0 %v279_v6 }
  0x4e   :  { %256 = vmatprep.subr.bf16.mxu0 %v384_v0 }
  0x51   :  { %257 = vmatpush3.bf16.msra.mxu0 %v280_v7 }
  0x52   :  { %258 = vmatprep.subr.bf16.mxu0 %v384_v0 }
  0x55   :  { %259 = vmatpush3.bf16.msra.mxu0 %v281_v8 }
  0x58   :  { %261 = vmatmul.mubr.bf16.vlgmr.msra.gmra.mrb[0].mxu0 %v282_v9 }
 0x12b   :  { %v174_v11 = vpop.f32.mrb[0].mxu0 }
 0x12c   :  { %v197_v12 = vadd.f32 %v234_v10, %v174_v11  ;;  %v262_v13 = vpop.f32.mrb[1].mxu0 }
 0x12d   :  { %v177_v15 = vpop.f32.mrb[2].mxu0 }
 0x12e   :  { %v199_v16 = vmax.f32 %v197_v12, 0.0  ;;  %v198_v17 = vadd.f32 %v234_v10, %v177_v15  ;;  %v263_v18 = vpop.f32.mrb[3].mxu0 }
 0x130   :  { %v203_v20 = vadd.f32 %v201_v14, %v199_v16  ;;  %v200_v21 = vmax.f32 %v198_v17, 0.0 }
 0x132   :  { %205 = vst [vmem:[#allocation9] sm:$0xff] %v203_v20  ;;  %v204_v22 = vadd.f32 %v202_v19, %v200_v21 }
 0x134   :  { %206 = vst [vmem:[#allocation9 + $0x8] sm:$0xff] %v204_v22 }
 0x135   :  { %360 = shalt.err (!%p357_p0)
}
 0x136   :  { %s361_s6 = scalar_lea.hbm %s480_s4, 256 }
 0x137   :  { %p362_p1 = scmp.ne.s32.totalorder %s480_s4, %s361_s6  ;;  %p365_p2 = scmp.lt.u32.totalorder %s361_s6, %s480_s4 }
 0x139   :  { %p367_p3 = pnand %p365_p2, %p362_p1 }
 0x13b   :  { %370 = shalt.err (!%p367_p3)
}
 0x13c   :  { %218 = dma.vmem_to_hbm [thread:$0]  %s213_s29, 256, %s480_s4, [#allocation5], %s382_s0, %s382_s0, %s383_s18  }
 0x13d   :  { %375 = dma.done.wait [#allocation5], 256  }
 0x13e   :  { %376 = vsyncadd [#allocation5], 4294967040 }
 0x13f   :  { %222 = vsyncpa [#allocation4], 1 }
 0x140   :  { %223 = vsyncpa [#allocation7], 1 }
 0x141   :  { %224 = vsyncpa [#allocation5], 1 }

</bundles_post_ra>
